<compile_context>
chip_gen: v7x
topology: tpu7x:2x2x1
jax: 0.10.0
libtpu: 0.0.40
codegen_flags: <defaults>
</compile_context>

<pallas_src>
import functools

import jax
import jax.numpy as jnp
from jax.experimental import pallas as pl
from jax.experimental.pallas import tpu as pltpu


def _fused_kernel(x_ref, w_ref, b_ref, o_ref):
    # x_ref: (tm, K_pad) bf16 patches, w_ref: (K_pad, E_pad) bf16 resident
    # weight, b_ref: (1, E_pad) f32 bias, o_ref: (tm, E_pad) output.
    # Single MXU dot with f32 accumulation, bias added once, cast on store.
    o_ref[...] = (
        jnp.dot(x_ref[...], w_ref[...], preferred_element_type=jnp.float32)
        + b_ref[...]
    ).astype(o_ref.dtype)


def _ktiled_kernel(x_ref, w_ref, b_ref, o_ref, acc_ref):
    # Fallback for weights too large to keep VMEM-resident: reduce over a K
    # grid axis with an f32 accumulator; bias added once in the epilogue.
    k = pl.program_id(1)

    @pl.when(k == 0)
    def _():
        acc_ref[...] = jnp.zeros_like(acc_ref)

    acc_ref[...] += jnp.dot(
        x_ref[...], w_ref[...], preferred_element_type=jnp.float32
    )

    @pl.when(k == pl.num_programs(1) - 1)
    def _():
        o_ref[...] = (acc_ref[...] + b_ref[...]).astype(o_ref.dtype)


def _round_up(x, m):
    return ((x + m - 1) // m) * m


def _largest_divisor_tile(n, cap):
    # Largest multiple of 128 that divides n and is <= cap.
    best, t = 128, 128
    while t <= min(cap, n):
        if n % t == 0:
            best = t
        t += 128
    return best


def _vmem_budget():
    # Scoped-VMEM limit and tile budget, derived from the actual chip so the
    # same code stays inside v7x's 64 MiB while using v5e/v6e's 128 MiB.
    try:
        cap = int(pltpu.get_tpu_info().vmem_capacity_bytes)
    except Exception:  # interpret mode / query unavailable -> be conservative
        cap = 64 * 1024 * 1024
    limit = min(cap * 3 // 4, 100 * 1024 * 1024)
    return int(limit), int(limit * 4 // 5)


@functools.partial(jax.jit, static_argnames=("patch_size", "flatten", "out_dtype"))
def flexi_patch_embed(x, weight, bias, patch_size, flatten=True, out_dtype=None):
    """Forward pass of FlexiPatchEmbed at the base (buffer) patch size.

    x:      (B, C, H, W)   NCHW, like PyTorch
    weight: (E, C, P, P)   PyTorch Conv2d weight layout
    bias:   (E,)
    out_dtype: output dtype (default x.dtype; pass jnp.bfloat16 to halve
               output HBM traffic when the downstream transformer is bf16).
    """
    B, C, H, W = x.shape
    E = weight.shape[0]
    ph, pw = patch_size
    gh, gw = H // ph, W // pw
    M = B * gh * gw
    K = C * ph * pw
    out_dtype = jnp.dtype(x.dtype if out_dtype is None else out_dtype)
    out_bytes = out_dtype.itemsize

    # ---- layout glue (XLA): non-overlapping patch extraction -> (M, K). With
    # an NCHW input the (C, ph, pw) columns of one patch are not a rectangular
    # block of x, so extraction cannot be a BlockSpec index_map;
    # allow_input_fusion below lets XLA fold the transpose/pad/cast into the
    # kernel's input DMA instead of materializing the patch matrix in HBM.
    # TODO(synk): accept NHWC inputs and fuse patch extraction fully in-kernel.
    xp = x.reshape(B, C, gh, ph, gw, pw)
    xp = jnp.transpose(xp, (0, 2, 4, 1, 3, 5)).reshape(M, K)
    wm = jnp.transpose(weight.reshape(E, K))          # (K, E), weight-only

    K_pad = _round_up(K, 128)
    E_pad = _round_up(E, 128)
    M8 = _round_up(M, 8)

    vmem_limit, tile_budget = _vmem_budget()
    w_bytes = K_pad * E_pad * 2                        # resident bf16 weight

    def fused_footprint(tm):
        # resident weight + double-buffered x tile + double-buffered out tile.
        return (w_bytes + 2 * tm * K_pad * 2 + 2 * tm * E_pad * out_bytes
                + 2 * E_pad * 4)

    use_fused = fused_footprint(256) <= tile_budget

    if use_fused:
        # ---- common path: weight fully resident, 1-D "parallel" grid over M.
        tm = 2048
        while tm > 256 and fused_footprint(tm) > tile_budget:
            tm //= 2
        tm = min(tm, M8)
        M_pad = _round_up(M, tm)

        # Zero-padding is exact: extra K columns contribute 0, extra M rows and
        # E columns are sliced off below.
        xp = jnp.pad(xp, ((0, M_pad - M), (0, K_pad - K))).astype(jnp.bfloat16)
        wm = jnp.pad(wm, ((0, K_pad - K), (0, E_pad - E))).astype(jnp.bfloat16)
        bm = jnp.pad(bias, (0, E_pad - E)).astype(jnp.float32).reshape(1, E_pad)

        cost = pl.CostEstimate(
            flops=2 * M_pad * K_pad * E_pad,
            transcendentals=0,
            bytes_accessed=(xp.size * 2 + wm.size * 2 + bm.size * 4
                            + M_pad * E_pad * out_bytes),
        )
        out = pl.pallas_call(
            _fused_kernel,
            out_shape=jax.ShapeDtypeStruct((M_pad, E_pad), out_dtype),
            grid_spec=pltpu.PrefetchScalarGridSpec(
                num_scalar_prefetch=0,
                grid=(M_pad // tm,),
                in_specs=[
                    pl.BlockSpec((tm, K_pad), lambda i: (i, 0)),
                    # Constant block index -> weight DMA'd once, stays resident.
                    pl.BlockSpec((K_pad, E_pad), lambda i: (0, 0)),
                    pl.BlockSpec((1, E_pad), lambda i: (0, 0)),
                ],
                out_specs=pl.BlockSpec((tm, E_pad), lambda i: (i, 0)),
            ),
            compiler_params=pltpu.CompilerParams(
                dimension_semantics=("parallel",),
                vmem_limit_bytes=vmem_limit,
                allow_input_fusion=[True, False, False],
            ),
            cost_estimate=cost,
        )(xp, wm, bm)
    else:
        # ---- fallback (weight too large to reside): tile K with an f32
        # accumulator; N stays a single lane-dense E_pad-wide tile.
        tk = _largest_divisor_tile(K_pad, cap=1024)

        def ktiled_footprint(tm):
            return (2 * tm * tk * 2 + 2 * tk * E_pad * 2
                    + 2 * tm * E_pad * out_bytes + tm * E_pad * 4
                    + 2 * E_pad * 4)

        tm = 1024
        while tm > 64 and ktiled_footprint(tm) > tile_budget:
            tm //= 2
        tm = min(tm, M8)
        M_pad = _round_up(M, tm)

        xp = jnp.pad(xp, ((0, M_pad - M), (0, K_pad - K))).astype(jnp.bfloat16)
        wm = jnp.pad(wm, ((0, K_pad - K), (0, E_pad - E))).astype(jnp.bfloat16)
        bm = jnp.pad(bias, (0, E_pad - E)).astype(jnp.float32).reshape(1, E_pad)

        cost = pl.CostEstimate(
            flops=2 * M_pad * K_pad * E_pad,
            transcendentals=0,
            bytes_accessed=(xp.size * 2 + wm.size * 2 * (M_pad // tm)
                            + bm.size * 4 + M_pad * E_pad * out_bytes),
        )
        out = pl.pallas_call(
            _ktiled_kernel,
            out_shape=jax.ShapeDtypeStruct((M_pad, E_pad), out_dtype),
            grid_spec=pltpu.PrefetchScalarGridSpec(
                num_scalar_prefetch=0,
                grid=(M_pad // tm, K_pad // tk),
                in_specs=[
                    pl.BlockSpec((tm, tk), lambda i, k: (i, k)),
                    pl.BlockSpec((tk, E_pad), lambda i, k: (k, 0)),
                    pl.BlockSpec((1, E_pad), lambda i, k: (0, 0)),
                ],
                out_specs=pl.BlockSpec((tm, E_pad), lambda i, k: (i, 0)),
                scratch_shapes=[pltpu.VMEM((tm, E_pad), jnp.float32)],
            ),
            compiler_params=pltpu.CompilerParams(
                dimension_semantics=("parallel", "arbitrary"),
                vmem_limit_bytes=vmem_limit,
                allow_input_fusion=[True, False, False],
            ),
            cost_estimate=cost,
        )(xp, wm, bm)

    out = out[:M, :E]   # no-op view when tm | M and E_pad == E
    if flatten:
        return out.reshape(B, gh * gw, E)                    # (B, N, E)
    # TODO(synk): for flatten=False the (B, E, gh, gw) layout could be written
    # directly by the out BlockSpec index_map instead of this transpose.
    return out.reshape(B, gh, gw, E).transpose(0, 3, 1, 2)   # (B, E, gh, gw)


if __name__ == "__main__":
    # Small, module-consistent shapes: batch=2, in_chans=4, img=16x16,
    # patch=4x4 -> grid 4x4 = 16 patches per image, embed_dim=32.
    B, C, H, W = 2, 4, 16, 16
    P = (4, 4)
    E = 32

    key = jax.random.PRNGKey(0)
    kx, kw, kb = jax.random.split(key, 3)
    x = jax.random.normal(kx, (B, C, H, W), dtype=jnp.float32)
    weight = jax.random.normal(kw, (E, C, P[0], P[1]), dtype=jnp.float32) * 0.02
    bias = jax.random.normal(kb, (E,), dtype=jnp.float32) * 0.02

    out = flexi_patch_embed(x, weight, bias, P, flatten=True)
    out = jax.block_until_ready(out)

    # Pure-JAX reference: same bf16-rounded operands through a stride-P conv
    # with f32 accumulation (conv -> + bias -> flatten(2) -> transpose(1,2)).
    xb = x.astype(jnp.bfloat16).astype(jnp.float32)
    wb = weight.astype(jnp.bfloat16).astype(jnp.float32)
    ref = jax.lax.conv_general_dilated(
        xb, wb, window_strides=P, padding="VALID",
        dimension_numbers=("NCHW", "OIHW", "NCHW"),
        precision=jax.lax.Precision.HIGHEST,
    ) + bias[None, :, None, None]
    ref = ref.reshape(B, E, -1).transpose(0, 2, 1)

    assert out.shape == (B, (H // P[0]) * (W // P[1]), E), out.shape
    err = float(jnp.max(jnp.abs(out - ref)))
    assert err < 1e-3, err
    print("KERNEL_OK")
</pallas_src>

<mosaic_0001>
module attributes {stable_mosaic.version = 11 : i64} {
  func.func @_fused_kernel(%arg0: i32, %arg1: memref<32x128xbf16, #tpu.memory_space<vmem>>, %arg2: memref<128x128xbf16, #tpu.memory_space<vmem>>, %arg3: memref<1x128xf32, #tpu.memory_space<vmem>>, %arg4: memref<32x128xf32, #tpu.memory_space<vmem>>) attributes {dimension_semantics = [#tpu.dimension_semantics<parallel>], iteration_bounds = array<i64: 1>, scalar_prefetch = 0 : i64, scratch_operands = 0 : i64, tpu.core_type = #tpu.core_type<tc>, window_params = [{transform_indices = @transform_0, window_bounds = array<i64: 32, 128>}, {pipeline_mode = #tpu.pipeline_mode<synchronous>, transform_indices = @transform_1, window_bounds = array<i64: 128, 128>}, {pipeline_mode = #tpu.pipeline_mode<synchronous>, transform_indices = @transform_2, window_bounds = array<i64: 1, 128>}, {transform_indices = @transform_3, window_bounds = array<i64: 32, 128>}]} {
    %c0 = arith.constant 0 : index
    %c0_0 = arith.constant 0 : index
    %0 = vector.load %arg1[%c0, %c0_0] : memref<32x128xbf16, #tpu.memory_space<vmem>>, vector<32x128xbf16>
    %c0_1 = arith.constant 0 : index
    %c0_2 = arith.constant 0 : index
    %1 = vector.load %arg2[%c0_1, %c0_2] : memref<128x128xbf16, #tpu.memory_space<vmem>>, vector<128x128xbf16>
    %cst = arith.constant dense<0.000000e+00> : vector<32x128xf32>
    %2 = tpu.matmul %0, %1, %cst {dimension_numbers = #tpu.dot_dimension_numbers<[1], [0], [0], [1], [0, 0, 1, 1], [], []>} : vector<32x128xbf16>, vector<128x128xbf16>, vector<32x128xf32> -> vector<32x128xf32>
    %c0_3 = arith.constant 0 : index
    %c0_4 = arith.constant 0 : index
    %3 = vector.load %arg3[%c0_3, %c0_4] : memref<1x128xf32, #tpu.memory_space<vmem>>, vector<1x128xf32>
    %4 = vector.broadcast %3 : vector<1x128xf32> to vector<32x128xf32>
    %5 = arith.addf %2, %4 : vector<32x128xf32>
    %c0_5 = arith.constant 0 : index
    %c0_6 = arith.constant 0 : index
    %6 = vector.load %arg4[%c0_5, %c0_6] : memref<32x128xf32, #tpu.memory_space<vmem>>, vector<32x128xf32>
    tpu.vector_store %arg4[%c0_5, %c0_6], %5 {strides = array<i32>} : memref<32x128xf32, #tpu.memory_space<vmem>>, vector<32x128xf32>,
    return
  }
  func.func @transform_0(%arg0: i32) -> (i32, i32) {
    %c0_i32 = arith.constant 0 : i32
    %c0_i32_0 = arith.constant 0 : i32
    return %arg0, %c0_i32 : i32, i32
  }
  func.func @transform_1(%arg0: i32) -> (i32, i32) {
    %c0_i32 = arith.constant 0 : i32
    %c0_i32_0 = arith.constant 0 : i32
    %c0_i32_1 = arith.constant 0 : i32
    return %c0_i32, %c0_i32_0 : i32, i32
  }
  func.func @transform_2(%arg0: i32) -> (i32, i32) {
    %c0_i32 = arith.constant 0 : i32
    %c0_i32_0 = arith.constant 0 : i32
    %c0_i32_1 = arith.constant 0 : i32
    return %c0_i32, %c0_i32_0 : i32, i32
  }
  func.func @transform_3(%arg0: i32) -> (i32, i32) {
    %c0_i32 = arith.constant 0 : i32
    %c0_i32_0 = arith.constant 0 : i32
    return %arg0, %c0_i32 : i32, i32
  }
}

</mosaic_0001>

<bundles_post_ra>
// kernel: flexi_patch_embed.2
= control target key start
LH: loop header
LB: loop body
LE: loop exit
PB: predicated region body
PF: predicated region fallthrough
CT: control target
= control target key end

     0   :  { %s423_s0 = inlined_call_operand.vmem [shape: bf16[128,128], index: 0, kind: input, shape index: {}]   ;;  %s424_s1 = inlined_call_operand.vmem [shape: f32[1,128], index: 1, kind: input, shape index: {}]   ;;  %s425_s2 = inlined_call_operand.vmem [shape: bf16[32,64], index: 2, kind: input, shape index: {}]   ;;  %s426_s3 = inlined_call_operand.<no memory space> [shape: bf16[], index: 3, kind: input, shape index: {}]   ;;  %s427_s4 = inlined_call_operand.hbm [shape: f32[32,128], index: 4, kind: output, shape index: {}]  }
   0x1   :  { %v9_v0 = vstv %s426_s3 }
   0x2   :  { %v10_v1 = vunpack.i.l.bf16 %v9_v0 }
   0x3   :  { %v312_v2 = vld [vmem:[%s423_s0] sm:$0xff]   ;;  %v33_v3 = vlaneseq  ;;  %v313_v4 = vld [vmem:[%s423_s0 + $0x8] sm:$0xff]   ;;  %v314_v5 = vld [vmem:[%s423_s0 + $0x10] sm:$0xff]  }
   0x4   :  { %288 = vmatprep.subr.bf16.mxu0 %v312_v2  ;;  %v315_v7 = vld [vmem:[%s423_s0 + $0x18] sm:$0xff]   ;;  %v30_v8 = vld [vmem:[%s425_s2] sm:$0xff]   ;;  %v265_v9 = vld [vmem:[%s425_s2 + $0x8] sm:$0xff]  }
   0x5   :  { %289 = vmatpush3.bf16.msra.mxu0 %v312_v2  ;;  %v34_v6 = vand.u32 127, %v33_v3 }
   0x6   :  { %290 = vmatprep.subr.bf16.mxu0 %v313_v4 }
   0x7   :  { %vm36_vm0 = vcmp.lt.s32.totalorder %v34_v6, 64 }
   0x9   :  { %291 = vmatpush3.bf16.msra.mxu0 %v313_v4 }
   0xa   :  { %292 = vmatprep.subr.bf16.mxu0 %v314_v5 }
   0xb   :  { %14 = vsyncpa [#allocation8], 0  ;;  %v31_v10 = vunpack.c.l.bf16 %v30_v8  ;;  %v52_v11 = vunpack.c.h.bf16 %v30_v8  ;;  %v74_v12 = vunpack.c.l.bf16 %v265_v9  ;;  %v96_v13 = vunpack.c.h.bf16 %v265_v9  ;;  %v316_v18 = vld [vmem:[%s423_s0 + $0x20] sm:$0xff]   ;;  %v317_v24 = vld [vmem:[%s423_s0 + $0x28] sm:$0xff]   ;;  %s347_s11 = smov [#allocation7]  }
   0xc   :  { %v346_v19 = vmov 0.0   ;;  %v318_v25 = vld [vmem:[%s423_s0 + $0x30] sm:$0xff]   ;;  %v319_v27 = vld [vmem:[%s423_s0 + $0x38] sm:$0xff]   ;;  %v267_v29 = vld [vmem:[%s424_s1] ss:$0 sm:$0xff]  ;;  %s253_s12 = sshll.u32 %s347_s11, 4  ;;  %s254_s12 = int_to_ptr.vmem [resolvable:$true] %s253_s12 }
   0xd   :  { %293 = vmatpush3.bf16.msra.mxu0 %v314_v5  ;;  %v37_v14 = vsel %vm36_vm0, %v31_v10, %v10_v1  ;;  %v58_v15 = vsel %vm36_vm0, %v52_v11, %v10_v1  ;;  %v80_v16 = vsel %vm36_vm0, %v74_v12, %v10_v1  ;;  %v102_v17 = vsel %vm36_vm0, %v96_v13, %v10_v1  ;;  %s322_s0 = scalar_lea.vmem %s254_s12, 512  ;;  %p327_p1 = scmp.lt.s32.totalorder %s254_s12, %s254_s12 }
   0xe   :  { %294 = vmatprep.subr.bf16.mxu0 %v315_v7  ;;  %v38_v20 = vpack.c.bf16 %v346_v19, %v37_v14  ;;  %v60_v21 = vpack.c.bf16 %v346_v19, %v58_v15  ;;  %v82_v22 = vpack.c.bf16 %v346_v19, %v80_v16  ;;  %v104_v23 = vpack.c.bf16 %v346_v19, %v102_v17  ;;  %p323_p0 = scmp.ne.s32.totalorder %s254_s12, %s322_s0  ;;  %p328_p2 = scmp.lt.s32.totalorder %s322_s0, %s322_s0 }
  0x10   :  { %40 = vst [vmem:[#allocation9] sm:$0xf] %v38_v20  ;;  %62 = vst [vmem:[#allocation9 + $0x4] sm:$0xf] %v60_v21  ;;  %p329_p3 = por %p328_p2, %p327_p1 }
  0x11   :  { %84 = vst [vmem:[#allocation9 + $0x8] sm:$0xf] %v82_v22  ;;  %106 = vst [vmem:[#allocation9 + $0xc] sm:$0xf] %v104_v23  ;;  %295 = vmatpush3.bf16.msra.mxu0 %v315_v7 }
  0x12   :  { %296 = vmatprep.subr.bf16.mxu0 %v316_v18  ;;  %p330_p4 = pnand %p329_p3, %p323_p0 }
  0x15   :  { %297 = vmatpush3.bf16.msra.mxu0 %v316_v18 }
  0x16   :  { %298 = vmatprep.subr.bf16.mxu0 %v317_v24 }
  0x17   :  { %v320_v26 = vld [vmem:[#allocation9] sm:$0xff]  }
  0x18   :  { %304 = vmatprep.mubr.bf16.mxu0 %v320_v26  ;;  %v321_v28 = vld [vmem:[#allocation9 + $0x8] sm:$0xff]  }
  0x19   :  { %299 = vmatpush3.bf16.msra.mxu0 %v317_v24 }
  0x1a   :  { %300 = vmatprep.subr.bf16.mxu0 %v318_v25 }
  0x1d   :  { %301 = vmatpush3.bf16.msra.mxu0 %v318_v25 }
  0x1e   :  { %302 = vmatprep.subr.bf16.mxu0 %v319_v27 }
  0x21   :  { %303 = vmatpush3.bf16.msra.mxu0 %v319_v27 }
  0x24   :  { %305 = vmatmul.mubr.bf16.vlgmr.msra.gmra.mrb[0].mxu0 %v321_v28 }
  0xf7   :  { %v306_v30 = vpop.f32.mrb[0].mxu0 }
  0xf8   :  { %v238_v31 = vadd.f32 %v306_v30, %v267_v29  ;;  %v229_v32 = vpop.f32.mrb[1].mxu0 }
  0xf9   :  { %v230_v33 = vadd.f32 %v267_v29, %v229_v32  ;;  %v307_v34 = vpop.f32.mrb[2].mxu0 }
  0xfa   :  { %246 = vst [vmem:[#allocation7 + $0x10] sm:$0xff] %v238_v31  ;;  %v241_v35 = vadd.f32 %v307_v34, %v267_v29  ;;  %v232_v36 = vpop.f32.mrb[3].mxu0 }
  0xfb   :  { %244 = vst [vmem:[#allocation7] sm:$0xff] %v230_v33  ;;  %v233_v37 = vadd.f32 %v267_v29, %v232_v36 }
  0xfc   :  { %247 = vst [vmem:[#allocation7 + $0x18] sm:$0xff] %v241_v35 }
  0xfd   :  { %245 = vst [vmem:[#allocation7 + $0x8] sm:$0xff] %v233_v37 }
  0xfe   :  { %333 = shalt.err (!%p330_p4)
}
  0xff   :  { %s334_s14 = scalar_lea.hbm %s427_s4, 512 }
 0x100   :  { %p335_p5 = scmp.ne.s32.totalorder %s427_s4, %s334_s14  ;;  %p338_p6 = scmp.lt.u32.totalorder %s334_s14, %s427_s4 }
 0x102   :  { %p340_p7 = pnand %p338_p6, %p335_p5 }
 0x104   :  { %343 = shalt.err (!%p340_p7)
}
 0x105   :  { %s348_s19 = smov 128   ;;  %s349_s20 = smov 8  }
 0x106   :  { %259 = dma.vmem_to_hbm [thread:$0]  %s254_s12, 512, %s427_s4, [#allocation8], %s348_s19, %s348_s19, %s349_s20  }
 0x107   :  { %344 = dma.done.wait [#allocation8], 512  }
 0x108   :  { %345 = vsyncadd [#allocation8], 4294966784 }
 0x109   :  { %263 = vsyncpa [#allocation8], 1 }

</bundles_post_ra>
